<compile_context>
chip_gen: v7x
topology: tpu7x:2x2x1
jax: 0.10.0
libtpu: 0.0.40
codegen_flags: <defaults>
</compile_context>

<pallas_src>
import functools

import jax
import jax.numpy as jnp
from jax.experimental import pallas as pl
from jax.experimental.pallas import tpu as pltpu

LANES = 128


def _round_up(x, m):
    return (x + m - 1) // m * m


# ----------------------------------------------------------------------------
# Pallas kernel: whole forward pass fused (small graph -> everything fits VMEM)
# ----------------------------------------------------------------------------
def make_gcn_kernel(f_in, hidden, n_cls):
    # static row offsets inside the packed parameter buffer
    r_w1 = 0
    r_w2 = f_in
    r_b1 = f_in + hidden
    r_b2 = f_in + hidden + 1

    def kernel(a_ref, x_ref, p_ref, out_ref):
        A = a_ref[...]                                   # [N, N] normalized adjacency
        X = x_ref[...]                                   # [N, F]

        # zero-cost static slices out of the single packed parameter buffer
        w1 = p_ref[r_w1:r_w1 + f_in, 0:hidden]           # [F, H]
        w2 = p_ref[r_w2:r_w2 + hidden, 0:n_cls]          # [H, C]
        b1 = p_ref[r_b1:r_b1 + 1, 0:hidden]              # [1, H]
        b2 = p_ref[r_b2:r_b2 + 1, 0:n_cls]               # [1, C]

        def mm(a, b):
            return jnp.dot(a, b, preferred_element_type=jnp.float32)

        # --- GCNConv 1: relu(A_hat @ (X @ W1) + b1)
        h1 = jnp.maximum(mm(A, mm(X, w1)) + b1, 0.0)     # [N, H]

        # --- dropout(p, training=False) -> identity (eval semantics)

        # --- GCNConv 2: A_hat @ (h1 @ W2) + b2  (narrow ordering: A-matmul is C lanes wide)
        logits = mm(A, mm(h1, w2)) + b2                  # [N, C]

        # --- log_softmax over classes (dim=1)
        mx = jnp.max(logits, axis=1, keepdims=True)
        lse = mx + jnp.log(jnp.sum(jnp.exp(logits - mx), axis=1, keepdims=True))
        out_ref[...] = logits - lse

    return kernel


def pack_params(params, f_in, hidden, n_cls):
    """Pack w1, w2, b1, b2 into one lane-dense [rows, 128] f32 buffer (single DMA)."""
    rows = _round_up(f_in + hidden + 2, 8)
    buf = jnp.zeros((rows, LANES), jnp.float32)
    buf = buf.at[0:f_in, 0:hidden].set(params["w1"])
    buf = buf.at[f_in:f_in + hidden, 0:n_cls].set(params["w2"])
    buf = buf.at[f_in + hidden, 0:hidden].set(params["b1"].reshape(-1))
    buf = buf.at[f_in + hidden + 1, 0:n_cls].set(params["b2"].reshape(-1))
    return buf


def gcn_forward(a_hat, x, params):
    N, f_in = x.shape
    hidden = params["w1"].shape[1]
    n_cls = params["w2"].shape[1]
    packed = pack_params(params, f_in, hidden, n_cls)
    kernel = make_gcn_kernel(f_in, hidden, n_cls)
    vmem = pl.BlockSpec(memory_space=pltpu.MemorySpace.VMEM)
    return pl.pallas_call(
        kernel,
        out_shape=jax.ShapeDtypeStruct((N, n_cls), jnp.float32),
        in_specs=[vmem, vmem, vmem],
        out_specs=vmem,
    )(a_hat, x, packed)


# ----------------------------------------------------------------------------
# Glue: dense normalized adjacency, deterministic parameters, pure-JAX reference
# ----------------------------------------------------------------------------
def normalized_adjacency(edge_index, num_nodes):
    # A_hat = D^-1/2 (A + I) D^-1/2  (PyG gcn_norm with add_self_loops=True)
    src, dst = edge_index[0], edge_index[1]
    A = jnp.zeros((num_nodes, num_nodes), jnp.float32)
    A = A.at[dst, src].set(1.0)               # message src -> dst, aggregated at dst (row)
    A = A + jnp.eye(num_nodes, dtype=jnp.float32)
    deg = jnp.sum(A, axis=1)
    dinv = 1.0 / jnp.sqrt(deg)
    return A * dinv[:, None] * dinv[None, :]


def init_params(key, in_feats, hidden=16, num_classes=4):
    ks = jax.random.split(key, 4)

    def rnd(k, shape, scale=0.1):
        return (scale * jax.random.normal(k, shape)).astype(jnp.float32)

    return dict(
        w1=rnd(ks[0], (in_feats, hidden)),        # conv1 weight (applied as X @ W)
        b1=rnd(ks[1], (1, hidden)),
        w2=rnd(ks[2], (hidden, num_classes)),     # conv2 weight
        b2=rnd(ks[3], (1, num_classes)),
    )


def reference_forward(a_hat, x, p):
    hp = functools.partial(jnp.dot, precision=jax.lax.Precision.HIGHEST)
    h1 = jnp.maximum(hp(a_hat, hp(x, p["w1"])) + p["b1"], 0.0)
    logits = hp(a_hat, hp(h1, p["w2"])) + p["b2"]
    return jax.nn.log_softmax(logits, axis=1)


if __name__ == "__main__":
    N = 64            # num nodes
    F_IN = 8          # dataset.num_features
    HID = 16          # args.hidden
    C = 4             # dataset.num_classes

    key = jax.random.PRNGKey(0)
    kx, kp = jax.random.split(key)

    # deterministic node features
    x = jax.random.normal(kx, (N, F_IN), dtype=jnp.float32)

    # deterministic ring graph (undirected -> both directions), edge_index: [2, 2N]
    idx = jnp.arange(N, dtype=jnp.int32)
    nxt = (idx + 1) % N
    edge_index = jnp.stack([jnp.concatenate([idx, nxt]),
                            jnp.concatenate([nxt, idx])], axis=0)

    a_hat = normalized_adjacency(edge_index, N)
    params = init_params(kp, F_IN, hidden=HID, num_classes=C)

    out = gcn_forward(a_hat, x, params)
    out = jax.block_until_ready(out)

    ref = reference_forward(a_hat, x, params)
    assert out.shape == (N, C)
    assert jnp.allclose(out, ref, atol=5e-3, rtol=5e-3), "mismatch vs pure-JAX reference"
    # log_softmax rows should sum to 1 in prob space
    assert jnp.allclose(jnp.sum(jnp.exp(out), axis=1), 1.0, atol=1e-3)

    print("KERNEL_OK")
</pallas_src>

<mosaic_0001>
module attributes {stable_mosaic.version = 11 : i64} {
  func.func @kernel(%arg0: memref<64x64xf32, #tpu.memory_space<vmem>>, %arg1: memref<64x8xf32, #tpu.memory_space<vmem>>, %arg2: memref<32x128xf32, #tpu.memory_space<vmem>>, %arg3: memref<64x4xf32, #tpu.memory_space<vmem>>) attributes {dimension_semantics = [], scalar_prefetch = 0 : i64, scratch_operands = 0 : i64, tpu.core_type = #tpu.core_type<tc>} {
    %c0 = arith.constant 0 : index
    %c0_0 = arith.constant 0 : index
    %0 = vector.load %arg0[%c0, %c0_0] : memref<64x64xf32, #tpu.memory_space<vmem>>, vector<64x64xf32>
    %c0_1 = arith.constant 0 : index
    %c0_2 = arith.constant 0 : index
    %1 = vector.load %arg1[%c0_1, %c0_2] : memref<64x8xf32, #tpu.memory_space<vmem>>, vector<64x8xf32>
    %c0_3 = arith.constant 0 : index
    %c0_4 = arith.constant 0 : index
    %2 = vector.load %arg2[%c0_3, %c0_4] : memref<32x128xf32, #tpu.memory_space<vmem>>, vector<8x16xf32>
    %c8 = arith.constant 8 : index
    %c0_5 = arith.constant 0 : index
    %3 = vector.load %arg2[%c8, %c0_5] : memref<32x128xf32, #tpu.memory_space<vmem>>, vector<16x4xf32>
    %c24 = arith.constant 24 : index
    %c0_6 = arith.constant 0 : index
    %4 = vector.load %arg2[%c24, %c0_6] : memref<32x128xf32, #tpu.memory_space<vmem>>, vector<1x16xf32>
    %c25 = arith.constant 25 : index
    %c0_7 = arith.constant 0 : index
    %5 = vector.load %arg2[%c25, %c0_7] : memref<32x128xf32, #tpu.memory_space<vmem>>, vector<1x4xf32>
    %cst = arith.constant dense<0.000000e+00> : vector<64x16xf32>
    %6 = tpu.matmul %1, %2, %cst {dimension_numbers = #tpu.dot_dimension_numbers<[1], [0], [0], [1], [0, 0, 1, 1], [], []>} : vector<64x8xf32>, vector<8x16xf32>, vector<64x16xf32> -> vector<64x16xf32>
    %cst_8 = arith.constant dense<0.000000e+00> : vector<64x16xf32>
    %7 = tpu.matmul %0, %6, %cst_8 {dimension_numbers = #tpu.dot_dimension_numbers<[1], [0], [0], [1], [0, 0, 1, 1], [], []>} : vector<64x64xf32>, vector<64x16xf32>, vector<64x16xf32> -> vector<64x16xf32>
    %8 = vector.broadcast %4 : vector<1x16xf32> to vector<64x16xf32>
    %9 = arith.addf %7, %8 : vector<64x16xf32>
    %cst_9 = arith.constant 0.000000e+00 : f32
    %10 = vector.broadcast %cst_9 : f32 to vector<64x16xf32>
    %11 = arith.maximumf %9, %10 : vector<64x16xf32>
    %cst_10 = arith.constant dense<0.000000e+00> : vector<64x4xf32>
    %12 = tpu.matmul %11, %3, %cst_10 {dimension_numbers = #tpu.dot_dimension_numbers<[1], [0], [0], [1], [0, 0, 1, 1], [], []>} : vector<64x16xf32>, vector<16x4xf32>, vector<64x4xf32> -> vector<64x4xf32>
    %cst_11 = arith.constant dense<0.000000e+00> : vector<64x4xf32>
    %13 = tpu.matmul %0, %12, %cst_11 {dimension_numbers = #tpu.dot_dimension_numbers<[1], [0], [0], [1], [0, 0, 1, 1], [], []>} : vector<64x64xf32>, vector<64x4xf32>, vector<64x4xf32> -> vector<64x4xf32>
    %14 = vector.broadcast %5 : vector<1x4xf32> to vector<64x4xf32>
    %15 = arith.addf %13, %14 : vector<64x4xf32>
    %cst_12 = arith.constant dense<0xFF800000> : vector<64xf32>
    %16 = vector.multi_reduction <maximumf>, %15, %cst_12 [1] : vector<64x4xf32> to vector<64xf32>
    %17 = vector.shape_cast %16 : vector<64xf32> to vector<64x1xf32>
    %18 = vector.broadcast %17 : vector<64x1xf32> to vector<64x4xf32>
    %19 = arith.subf %15, %18 : vector<64x4xf32>
    %20 = math.exp %19 : vector<64x4xf32>
    %cst_13 = arith.constant dense<0.000000e+00> : vector<64xf32>
    %21 = vector.multi_reduction <add>, %20, %cst_13 [1] : vector<64x4xf32> to vector<64xf32>
    %22 = vector.shape_cast %21 : vector<64xf32> to vector<64x1xf32>
    %23 = math.log %22 : vector<64x1xf32>
    %24 = arith.addf %17, %23 : vector<64x1xf32>
    %25 = vector.broadcast %24 : vector<64x1xf32> to vector<64x4xf32>
    %26 = arith.subf %15, %25 : vector<64x4xf32>
    %c0_14 = arith.constant 0 : index
    %c0_15 = arith.constant 0 : index
    %27 = vector.load %arg3[%c0_14, %c0_15] : memref<64x4xf32, #tpu.memory_space<vmem>>, vector<64x4xf32>
    tpu.vector_store %arg3[%c0_14, %c0_15], %26 {strides = array<i32>} : memref<64x4xf32, #tpu.memory_space<vmem>>, vector<64x4xf32>,
    return
  }
}

</mosaic_0001>

<bundles_post_ra>
// kernel: tpu_custom_call.1
= control target key start
LH: loop header
LB: loop body
LE: loop exit
PB: predicated region body
PF: predicated region fallthrough
CT: control target
= control target key end

     0   :  { %8 = vsyncpa [#allocation3], 0  ;;  %s952_s12 = smov [#allocation2]   ;;  %s1215_s0 = inlined_call_operand.vmem [shape: f32[64,64], index: 0, kind: input, shape index: {}]   ;;  %s1216_s1 = inlined_call_operand.vmem [shape: f32[64,8], index: 1, kind: input, shape index: {}]   ;;  %s1217_s2 = inlined_call_operand.hbm [shape: f32[32,128], index: 2, kind: input, shape index: {}]   ;;  %s1218_s3 = inlined_call_operand.vmem [shape: f32[64,4], index: 3, kind: output, shape index: {}]  }
   0x1   :  { %s18_s13 = sshll.u32 %s952_s12, 4  ;;  %s928_s16 = scalar_lea.hbm %s1217_s2, 512  ;;  %s19_s13 = int_to_ptr.vmem [resolvable:$true] %s18_s13 }
   0x2   :  { %p929_p0 = scmp.ne.s32.totalorder %s1217_s2, %s928_s16  ;;  %p932_p1 = scmp.lt.u32.totalorder %s928_s16, %s1217_s2 }
   0x4   :  { %p934_p2 = pnand %p932_p1, %p929_p0 }
   0x6   :  { %937 = shalt.err (!%p934_p2)
}
   0x7   :  { %s938_s21 = scalar_lea.vmem %s19_s13, 512  ;;  %p943_p4 = scmp.lt.s32.totalorder %s19_s13, %s19_s13 }
   0x8   :  { %p939_p3 = scmp.ne.s32.totalorder %s19_s13, %s938_s21  ;;  %p944_p5 = scmp.lt.s32.totalorder %s938_s21, %s938_s21 }
   0xa   :  { %p945_p6 = por %p944_p5, %p943_p4 }
   0xc   :  { %p946_p7 = pnand %p945_p6, %p939_p3 }
   0xe   :  { %949 = shalt.err (!%p946_p7)
}
   0xf   :  { %s953_s22 = smov 128   ;;  %s954_s23 = smov 8  }
  0x10   :  { %24 = dma.hbm_to_vmem [thread:$0]  %s1217_s2, 512, %s19_s13, [#allocation3], %s953_s22, %s953_s22, %s954_s23  }
  0x11   :  { %950 = dma.done.wait [#allocation3], 512  }
  0x12   :  { %951 = vsyncadd [#allocation3], 4294966784  ;;  %vm49_vm0 = vcmask 64512   ;;  %v44_v0 = vld [vmem:[#allocation2] sm:$0xff]  ;;  %v37_v2 = vld [vmem:[%s1216_s1 + $0x8] sm:$0xff]  ;;  %vm183_vm1 = vcmask 523264  }
  0x13   :  { %v36_v1 = vld [vmem:[%s1216_s1] sm:$0xff]  ;;  %763 = vmatprep.subr.mxu0 %v44_v0  ;;  %v38_v3 = vld [vmem:[%s1216_s1 + $0x10] sm:$0xff]  ;;  %v39_v4 = vld [vmem:[%s1216_s1 + $0x18] sm:$0xff]  ;;  %vm321_vm2 = vcmask 130048   ;;  %vm560_vm3 = vcmask 31744  }
  0x14   :  { %765 = vmatprep.mubr.msk.f32.mxu0 %vm49_vm0, %v36_v1  ;;  %764 = vmatpush3.msra.mxu0 %v44_v0  ;;  %v40_v5 = vld [vmem:[%s1216_s1 + $0x20] sm:$0xff]  ;;  %v41_v6 = vld [vmem:[%s1216_s1 + $0x28] sm:$0xff]  ;;  %v42_v7 = vld [vmem:[%s1216_s1 + $0x30] sm:$0xff] }
  0x15   :  { %766 = vmatmul.mubr.msk.f32.vlgmr.msra.gmra.mrb[0].mxu0 %vm49_vm0, %v37_v2  ;;  %v43_v8 = vld [vmem:[%s1216_s1 + $0x38] sm:$0xff]  ;;  %v1022_v9 = vld [vmem:[%s1215_s0] sm:$0xff]  ;;  %v45_v10 = vld [vmem:[#allocation2 + $0x8] sm:$0xff] }
  0x16   :  { %768 = vmatprep.mubr.msk.f32.mxu0 %vm49_vm0, %v38_v3  ;;  %793 = vmatprep.mubr.msk.f32.mxu1 %vm183_vm1, %v1022_v9  ;;  %v46_v11 = vld [vmem:[#allocation2 + $0x10] sm:$0xff]  ;;  %v1029_v25 = vld [vmem:[%s1215_s0 + $0x8] sm:$0xff]  ;;  %v1040_v27 = vld [vmem:[%s1215_s0 + $0x18] sm:$0xff] }
  0x17   :  { %v865_v12 = vpack.c.bf16 %v46_v11, %v45_v10  ;;  %v30_v26 = vld [vmem:[%s1215_s0 + $0x10] sm:$0xff]  ;;  %v1045_v28 = vld [vmem:[%s1215_s0 + $0x20] sm:$0xff]  ;;  %v1054_v29 = vld [vmem:[%s1215_s0 + $0x28] sm:$0xff] }
  0x18   :  { %v1059_v30 = vld [vmem:[%s1215_s0 + $0x30] sm:$0xff]  ;;  %v1068_v31 = vld [vmem:[%s1215_s0 + $0x38] sm:$0xff] }
  0x19   :  { %769 = vmatmul.mubr.msk.f32.gmra.mrb[2].mxu0 %vm49_vm0, %v39_v4  ;;  %866 = vmatprep.subr.bf16.mxu0 %v865_v12  ;;  %v686_v32 = vld [vmem:[#allocation2 + $0x18] ss:$0 sm:$0xff] }
  0x1a   :  { %771 = vmatprep.mubr.msk.f32.mxu0 %vm49_vm0, %v40_v5  ;;  %868 = vmatpush3.bf16.msra.mxu0 %v865_v12  ;;  %v703_v5 = vld [vmem:[#allocation2 + $0x19] ss:$0 sm:$0xff] }
  0x1d   :  { %772 = vmatmul.mubr.msk.f32.gmra.mrb[4].mxu0 %vm49_vm0, %v41_v6 }
  0x1e   :  { %774 = vmatprep.mubr.msk.f32.mxu0 %vm49_vm0, %v42_v7 }
  0x21   :  { %775 = vmatmul.mubr.msk.f32.gmra.mrb[6].mxu0 %vm49_vm0, %v43_v8 }
  0xe8   :  { %v767_v13 = vpop.f32.mrb[0].mxu0 }
  0xe9   :  { %v140_v14 = vpop.f32.mrb[1].mxu0 }
  0xea   :  { %v849_v15 = vpack.c.bf16 %v767_v13, %v140_v14 }
  0xec   :  { %v770_v16 = vpop.f32.mrb[2].mxu0  ;;  %850 = vmatprep.subr.bf16.mxu1 %v849_v15 }
  0xed   :  { %v150_v17 = vpop.f32.mrb[3].mxu0  ;;  %852 = vmatpush3.bf16.msra.mxu1 %v849_v15 }
  0xee   :  { %v853_v18 = vpack.c.bf16 %v770_v16, %v150_v17 }
  0xf0   :  { %v773_v19 = vpop.f32.mrb[4].mxu0  ;;  %854 = vmatprep.subr.bf16.mxu1 %v853_v18 }
  0xf1   :  { %v160_v20 = vpop.f32.mrb[5].mxu0  ;;  %856 = vmatpush3.bf16.msra.mxu1 %v853_v18 }
  0xf2   :  { %v857_v21 = vpack.c.bf16 %v773_v19, %v160_v20 }
  0xf4   :  { %v776_v22 = vpop.f32.mrb[6].mxu0  ;;  %858 = vmatprep.subr.bf16.mxu1 %v857_v21 }
  0xf5   :  { %v170_v23 = vpop.f32.mrb[7].mxu0  ;;  %860 = vmatpush3.bf16.msra.mxu1 %v857_v21 }
  0xf6   :  { %v861_v24 = vpack.c.bf16 %v776_v22, %v170_v23 }
  0xf8   :  { %862 = vmatprep.subr.bf16.mxu1 %v861_v24 }
  0xf9   :  { %864 = vmatpush3.bf16.msra.mxu1 %v861_v24 }
  0xfc   :  { %794 = vmatmul.mubr.msk.f32.vlgmr.msra.gmra.mrb[0].mxu1 %vm183_vm1, %v1029_v25 }
  0xfd   :  { %796 = vmatprep.mubr.msk.f32.mxu1 %vm183_vm1, %v30_v26 }
 0x100   :  { %797 = vmatmul.mubr.msk.f32.gmra.mrb[2].mxu1 %vm183_vm1, %v1040_v27 }
 0x101   :  { %799 = vmatprep.mubr.msk.f32.mxu1 %vm183_vm1, %v1045_v28 }
 0x104   :  { %800 = vmatmul.mubr.msk.f32.gmra.mrb[4].mxu1 %vm183_vm1, %v1054_v29 }
 0x105   :  { %802 = vmatprep.mubr.msk.f32.mxu1 %vm183_vm1, %v1059_v30 }
 0x108   :  { %803 = vmatmul.mubr.msk.f32.gmra.mrb[6].mxu1 %vm183_vm1, %v1068_v31 }
 0x109   :  { %840 = vmatprep.mubr.msk.f32.mxu1 %vm183_vm1, %v30_v26 }
 0x1cf   :  { %v795_v33 = vpop.f32.mrb[0].mxu1 }
 0x1d0   :  { %v280_v34 = vadd.f32 %v795_v33, %v686_v32  ;;  %v274_v35 = vpop.f32.mrb[1].mxu1 }
 0x1d1   :  { %v275_v36 = vadd.f32 %v686_v32, %v274_v35 }
 0x1d2   :  { %v314_v39 = vmax.f32 %v280_v34, 0.0 }
 0x1d3   :  { %v313_v37 = vmax.f32 %v275_v36, 0.0  ;;  %v798_v38 = vpop.f32.mrb[2].mxu1 }
 0x1d4   :  { %v290_v40 = vadd.f32 %v798_v38, %v686_v32  ;;  %v284_v41 = vpop.f32.mrb[3].mxu1 }
 0x1d5   :  { %v285_v42 = vadd.f32 %v686_v32, %v284_v41  ;;  %809 = vmatprep.mubr.msk.f32.mxu0 %vm321_vm2, %v313_v37 }
 0x1d6   :  { %810 = vmatmul.mubr.msk.f32.vlgmr.msra.gmra.mrb[8].mxu0 %vm321_vm2, %v314_v39  ;;  %v316_v45 = vmax.f32 %v290_v40, 0.0 }
 0x1d7   :  { %v315_v43 = vmax.f32 %v285_v42, 0.0  ;;  %v801_v44 = vpop.f32.mrb[4].mxu1 }
 0x1d8   :  { %v300_v46 = vadd.f32 %v801_v44, %v686_v32  ;;  %v294_v47 = vpop.f32.mrb[5].mxu1 }
 0x1d9   :  { %v295_v48 = vadd.f32 %v686_v32, %v294_v47  ;;  %812 = vmatprep.mubr.msk.f32.mxu0 %vm321_vm2, %v315_v43 }
 0x1da   :  { %813 = vmatmul.mubr.msk.f32.gmra.mrb[10].mxu0 %vm321_vm2, %v316_v45  ;;  %v318_v51 = vmax.f32 %v300_v46, 0.0 }
 0x1db   :  { %v317_v49 = vmax.f32 %v295_v48, 0.0  ;;  %v804_v50 = vpop.f32.mrb[6].mxu1 }
 0x1dc   :  { %v310_v52 = vadd.f32 %v804_v50, %v686_v32  ;;  %v304_v53 = vpop.f32.mrb[7].mxu1 }
 0x1dd   :  { %v305_v54 = vadd.f32 %v686_v32, %v304_v53  ;;  %815 = vmatprep.mubr.msk.f32.mxu0 %vm321_vm2, %v317_v49 }
 0x1de   :  { %816 = vmatmul.mubr.msk.f32.gmra.mrb[12].mxu0 %vm321_vm2, %v318_v51  ;;  %v320_v56 = vmax.f32 %v310_v52, 0.0 }
 0x1df   :  { %v319_v55 = vmax.f32 %v305_v54, 0.0 }
 0x1e1   :  { %818 = vmatprep.mubr.msk.f32.mxu0 %vm321_vm2, %v319_v55 }
 0x1e2   :  { %819 = vmatmul.mubr.msk.f32.gmra.mrb[14].mxu0 %vm321_vm2, %v320_v56 }
 0x1e3   :  { %837 = vmatprep.mubr.msk.f32.mxu0 %vm183_vm1, %v1022_v9 }
 0x2a9   :  { %v811_v57 = vpop.f32.mrb[8].mxu0 }
 0x2aa   :  { %v412_v58 = vpop.f32.mrb[9].mxu0 }
 0x2ab   :  { %v869_v59 = vpack.c.bf16 %v811_v57, %v412_v58 }
 0x2ad   :  { %v814_v60 = vpop.f32.mrb[10].mxu0  ;;  %870 = vmatprep.subr.bf16.mxu0 %v869_v59  ;;  %885 = vmatprep.subr.bf16.mxu1 %v869_v59 }
 0x2ae   :  { %v422_v61 = vpop.f32.mrb[11].mxu0  ;;  %872 = vmatpush3.bf16.msra.mxu0 %v869_v59  ;;  %889 = vmatpush3.bf16.msra.mxu1 %v869_v59 }
 0x2af   :  { %v873_v62 = vpack.c.bf16 %v814_v60, %v422_v61 }
 0x2b1   :  { %v817_v63 = vpop.f32.mrb[12].mxu0  ;;  %874 = vmatprep.subr.bf16.mxu0 %v873_v62  ;;  %886 = vmatprep.subr.bf16.mxu1 %v873_v62 }
 0x2b2   :  { %v432_v0 = vpop.f32.mrb[13].mxu0  ;;  %876 = vmatpush3.bf16.msra.mxu0 %v873_v62  ;;  %890 = vmatpush3.bf16.msra.mxu1 %v873_v62 }
 0x2b3   :  { %v877_v1 = vpack.c.bf16 %v817_v63, %v432_v0 }
 0x2b5   :  { %v820_v2 = vpop.f32.mrb[14].mxu0  ;;  %878 = vmatprep.subr.bf16.mxu0 %v877_v1  ;;  %887 = vmatprep.subr.bf16.mxu1 %v877_v1 }
 0x2b6   :  { %v442_v3 = vpop.f32.mrb[15].mxu0  ;;  %880 = vmatpush3.bf16.msra.mxu0 %v877_v1  ;;  %891 = vmatpush3.bf16.msra.mxu1 %v877_v1 }
 0x2b7   :  { %v881_v4 = vpack.c.bf16 %v820_v2, %v442_v3 }
 0x2b9   :  { %882 = vmatprep.subr.bf16.mxu0 %v881_v4  ;;  %888 = vmatprep.subr.bf16.mxu1 %v881_v4 }
 0x2ba   :  { %884 = vmatpush3.bf16.msra.mxu0 %v881_v4  ;;  %892 = vmatpush3.bf16.msra.mxu1 %v881_v4 }
 0x2bd   :  { %838 = vmatmul.mubr.msk.f32.vlgmr.msra.gmra.mrb[16].mxu0 %vm183_vm1, %v1029_v25  ;;  %841 = vmatmul.mubr.msk.f32.vlgmr.msra.gmra.mrb[8].mxu1 %vm183_vm1, %v1040_v27 }
 0x2be   :  { %843 = vmatprep.mubr.msk.f32.mxu1 %vm183_vm1, %v1045_v28 }
 0x2c1   :  { %844 = vmatmul.mubr.msk.f32.gmra.mrb[10].mxu1 %vm183_vm1, %v1054_v29 }
 0x2c2   :  { %846 = vmatprep.mubr.msk.f32.mxu1 %vm183_vm1, %v1059_v30 }
 0x2c5   :  { %847 = vmatmul.mubr.msk.f32.gmra.mrb[12].mxu1 %vm183_vm1, %v1068_v31 }
 0x390   :  { %v839_v6 = vpop.f32.mrb[16].mxu0  ;;  %v842_v7 = vpop.f32.mrb[8].mxu1 }
 0x391   :  { %v1095_v8 = vadd.f32 %v839_v6, %v703_v5  ;;  %v1097_v9 = vadd.f32 %v842_v7, %v703_v5  ;;  %v521_v10 = vpop.f32.mrb[17].mxu0  ;;  %v531_v11 = vpop.f32.mrb[9].mxu1 }
 0x392   :  { %v1099_v12 = vadd.f32 %v703_v5, %v531_v11  ;;  %v1101_v13 = vadd.f32 %v703_v5, %v521_v10 }
 0x393   :  { %v570_v14 = vsel %vm560_vm3, %v1097_v9, -inf  ;;  %v564_v15 = vsel %vm560_vm3, %v1095_v8, -inf }
 0x394   :  { %571 = vmax.xlane.f32.xlu1 %v570_v14  ;;  %565 = vmax.xlane.f32.xlu0 %v564_v15  ;;  %v845_v16 = vpop.f32.mrb[10].mxu1  ;;  %v567_v19 = vsel %vm560_vm3, %v1099_v12, -inf  ;;  %v561_v21 = vsel %vm560_vm3, %v1101_v13, -inf }
 0x395   :  { %v1107_v17 = vadd.f32 %v845_v16, %v703_v5  ;;  %v541_v18 = vpop.f32.mrb[11].mxu1 }
 0x396   :  { %v1111_v20 = vadd.f32 %v703_v5, %v541_v18 }
 0x397   :  { %v576_v25 = vsel %vm560_vm3, %v1107_v17, -inf }
 0x398   :  { %568 = vmax.xlane.f32.xlu1 %v567_v19  ;;  %562 = vmax.xlane.f32.xlu0 %v561_v21  ;;  %v848_v22 = vpop.f32.mrb[12].mxu1  ;;  %v573_v26 = vsel %vm560_vm3, %v1111_v20, -inf }
 0x399   :  { %v1115_v23 = vadd.f32 %v848_v22, %v703_v5  ;;  %v551_v24 = vpop.f32.mrb[13].mxu1 }
 0x39a   :  { %v1121_v27 = vadd.f32 %v703_v5, %v551_v24 }
 0x39b   :  { %v582_v28 = vsel %vm560_vm3, %v1115_v23, -inf }
 0x39c   :  { %577 = vmax.xlane.f32.xlu1 %v576_v25  ;;  %574 = vmax.xlane.f32.xlu0 %v573_v26  ;;  %v579_v29 = vsel %vm560_vm3, %v1121_v27, -inf }
 0x3a0   :  { %583 = vmax.xlane.f32.xlu1 %v582_v28  ;;  %580 = vmax.xlane.f32.xlu0 %v579_v29 }
 0x421   :  { %v1127_v30 = vpop.xlane.xlu1 %571  ;;  %v1129_v31 = vpop.xlane.xlu0 %565 }
 0x422   :  { %v588_v32 = vsub.f32 %v1097_v9, %v1127_v30  ;;  %v586_v33 = vsub.f32 %v1095_v8, %v1129_v31 }
 0x424   :  { %v595_v34 = vmul.f32 1.442695, %v586_v33  ;;  %v599_v35 = vmul.f32 1.442695, %v588_v32 }
 0x425   :  { %v1135_v36 = vpop.xlane.xlu1 %568  ;;  %v1137_v37 = vpop.xlane.xlu0 %562 }
 0x426   :  { %v587_v38 = vsub.f32 %v1099_v12, %v1135_v36  ;;  %v585_v39 = vsub.f32 %v1101_v13, %v1137_v37  ;;  %896 = vpow2.f32 %v595_v34 }
 0x427   :  { %898 = vpow2.f32 %v599_v35 }
 0x428   :  { %v593_v40 = vmul.f32 1.442695, %v585_v39  ;;  %v597_v41 = vmul.f32 1.442695, %v587_v38 }
 0x429   :  { %v1143_v42 = vpop.xlane.xlu1 %577  ;;  %v1145_v43 = vpop.xlane.xlu0 %574 }
 0x42a   :  { %v590_v44 = vsub.f32 %v1107_v17, %v1143_v42  ;;  %v589_v45 = vsub.f32 %v1111_v20, %v1145_v43  ;;  %900 = vpow2.f32 %v593_v40 }
 0x42b   :  { %902 = vpow2.f32 %v597_v41 }
 0x42c   :  { %v603_v46 = vmul.f32 1.442695, %v590_v44  ;;  %v601_v47 = vmul.f32 1.442695, %v589_v45 }
 0x42d   :  { %v1151_v48 = vpop.xlane.xlu1 %583  ;;  %v1153_v49 = vpop.xlane.xlu0 %580 }
 0x42e   :  { %904 = vpow2.f32 %v603_v46  ;;  %v592_v50 = vsub.f32 %v1115_v23, %v1151_v48  ;;  %v591_v51 = vsub.f32 %v1121_v27, %v1153_v49 }
 0x42f   :  { %906 = vpow2.f32 %v601_v47 }
 0x430   :  { %v607_v52 = vmul.f32 1.442695, %v592_v50  ;;  %v897_v53 = vpop.eup %896  ;;  %v605_v54 = vmul.f32 1.442695, %v591_v51 }
 0x431   :  { %v612_v55 = vsel %vm560_vm3, %v897_v53, 0.0  ;;  %v899_v56 = vpop.eup %898 }
 0x432   :  { %908 = vpow2.f32 %v607_v52  ;;  %613 = vadd.xlane.f32.xlu1 %v612_v55  ;;  %v618_v58 = vsel %vm560_vm3, %v899_v56, 0.0 }
 0x433   :  { %910 = vpow2.f32 %v605_v54 }
 0x434   :  { %v901_v57 = vpop.eup %900 }
 0x435   :  { %v609_v59 = vsel %vm560_vm3, %v901_v57, 0.0  ;;  %v903_v60 = vpop.eup %902 }
 0x436   :  { %619 = vadd.xlane.f32.xlu1 %v618_v58  ;;  %610 = vadd.xlane.f32.xlu0 %v609_v59  ;;  %v615_v63 = vsel %vm560_vm3, %v903_v60, 0.0 }
 0x438   :  { %v905_v61 = vpop.eup %904 }
 0x439   :  { %v624_v62 = vsel %vm560_vm3, %v905_v61, 0.0  ;;  %v907_v0 = vpop.eup %906 }
 0x43a   :  { %625 = vadd.xlane.f32.xlu1 %v624_v62  ;;  %616 = vadd.xlane.f32.xlu0 %v615_v63  ;;  %v621_v3 = vsel %vm560_vm3, %v907_v0, 0.0 }
 0x43c   :  { %v909_v1 = vpop.eup %908 }
 0x43d   :  { %v630_v2 = vsel %vm560_vm3, %v909_v1, 0.0  ;;  %v911_v4 = vpop.eup %910 }
 0x43e   :  { %631 = vadd.xlane.f32.xlu1 %v630_v2  ;;  %622 = vadd.xlane.f32.xlu0 %v621_v3  ;;  %v627_v5 = vsel %vm560_vm3, %v911_v4, 0.0 }
 0x442   :  { %628 = vadd.xlane.f32.xlu0 %v627_v5 }
 0x4bf   :  { %v614_v6 = vpop.xlane.xlu1 %613 }
 0x4c0   :  { %912 = vlog2.f32 %v614_v6 }
 0x4c3   :  { %v620_v7 = vpop.xlane.xlu1 %619  ;;  %v611_v10 = vpop.xlane.xlu0 %610 }
 0x4c4   :  { %914 = vlog2.f32 %v620_v7 }
 0x4c5   :  { %916 = vlog2.f32 %v611_v10 }
 0x4c7   :  { %v626_v11 = vpop.xlane.xlu1 %625  ;;  %v617_v14 = vpop.xlane.xlu0 %616 }
 0x4c8   :  { %918 = vlog2.f32 %v626_v11 }
 0x4c9   :  { %920 = vlog2.f32 %v617_v14 }
 0x4ca   :  { %v913_v15 = vpop.eup %912 }
 0x4cb   :  { %v636_v16 = vmul.f32 0.6931472, %v913_v15  ;;  %v632_v18 = vpop.xlane.xlu1 %631  ;;  %v623_v19 = vpop.xlane.xlu0 %622 }
 0x4cc   :  { %922 = vlog2.f32 %v632_v18 }
 0x4cd   :  { %v650_v21 = vadd.f32 %v636_v16, %v1129_v31  ;;  %924 = vlog2.f32 %v623_v19 }
 0x4ce   :  { %v915_v22 = vpop.eup %914 }
 0x4cf   :  { %v917_v24 = vpop.eup %916  ;;  %v658_v25 = vsub.f32 %v1095_v8, %v650_v21  ;;  %v640_v26 = vmul.f32 0.6931472, %v915_v22  ;;  %v629_v28 = vpop.xlane.xlu0 %628 }
 0x4d0   :  { %v634_v29 = vmul.f32 0.6931472, %v917_v24  ;;  %926 = vlog2.f32 %v629_v28 }
 0x4d1   :  { %666 = vst.msk [vmem:[%s1218_s3 + $0x8] sm:$0xff] %vm560_vm3, %v658_v25  ;;  %v652_v32 = vadd.f32 %v640_v26, %v1127_v30 }
 0x4d2   :  { %v919_v33 = vpop.eup %918  ;;  %v649_v34 = vadd.f32 %v634_v29, %v1137_v37 }
 0x4d3   :  { %v921_v31 = vpop.eup %920  ;;  %v660_v35 = vsub.f32 %v1097_v9, %v652_v32  ;;  %v644_v38 = vmul.f32 0.6931472, %v919_v33 }
 0x4d4   :  { %v657_v8 = vsub.f32 %v1101_v13, %v649_v34  ;;  %v638_v39 = vmul.f32 0.6931472, %v921_v31 }
 0x4d5   :  { %668 = vst.msk [vmem:[%s1218_s3 + $0x18] sm:$0xff] %vm560_vm3, %v660_v35  ;;  %v654_v40 = vadd.f32 %v644_v38, %v1143_v42 }
 0x4d6   :  { %v923_v41 = vpop.eup %922  ;;  %665 = vst.msk [vmem:[%s1218_s3] sm:$0xff] %vm560_vm3, %v657_v8  ;;  %v651_v30 = vadd.f32 %v638_v39, %v1135_v36 }
 0x4d7   :  { %v925_v9 = vpop.eup %924  ;;  %v662_v37 = vsub.f32 %v1107_v17, %v654_v40  ;;  %v648_v13 = vmul.f32 0.6931472, %v923_v41 }
 0x4d8   :  { %v659_v44 = vsub.f32 %v1099_v12, %v651_v30  ;;  %v642_v45 = vmul.f32 0.6931472, %v925_v9 }
 0x4d9   :  { %670 = vst.msk [vmem:[%s1218_s3 + $0x28] sm:$0xff] %vm560_vm3, %v662_v37  ;;  %v656_v42 = vadd.f32 %v648_v13, %v1151_v48 }
 0x4da   :  { %v927_v46 = vpop.eup %926  ;;  %667 = vst.msk [vmem:[%s1218_s3 + $0x10] sm:$0xff] %vm560_vm3, %v659_v44  ;;  %v653_v36 = vadd.f32 %v642_v45, %v1145_v43 }
 0x4db   :  { %v664_v17 = vsub.f32 %v1115_v23, %v656_v42  ;;  %v646_v47 = vmul.f32 0.6931472, %v927_v46 }
 0x4dc   :  { %v661_v12 = vsub.f32 %v1111_v20, %v653_v36 }
 0x4dd   :  { %672 = vst.msk [vmem:[%s1218_s3 + $0x38] sm:$0xff] %vm560_vm3, %v664_v17  ;;  %v655_v48 = vadd.f32 %v646_v47, %v1153_v49 }
 0x4de   :  { %669 = vst.msk [vmem:[%s1218_s3 + $0x20] sm:$0xff] %vm560_vm3, %v661_v12 }
 0x4df   :  { %v663_v50 = vsub.f32 %v1121_v27, %v655_v48 }
 0x4e1   :  { %671 = vst.msk [vmem:[%s1218_s3 + $0x30] sm:$0xff] %vm560_vm3, %v663_v50 }
 0x4e2   :  { %677 = vsyncpa [#allocation3], 1 }

</bundles_post_ra>
